<compile_context>
chip_gen: v5e
topology: v5e:2x2
jax: 0.10.0
libtpu: 0.0.40
codegen_flags: <defaults>
</compile_context>

<pallas_src>
import functools

import jax
import jax.numpy as jnp
from jax import lax
from jax.experimental import pallas as pl
from jax.experimental.pallas import tpu as pltpu

# ---- hyperparameters (module __init__ args) ---------------------------------
L_FIRST = 4          # input channels
SCI_L_SECOND = 32    # hidden channels
CLASSES = 10         # output classes
SCI_BN_EPS = 1e-5
SCI_BIAS = True
SCI_DROPOUT = 0.0
BATCH = 2

LANE = 128           # TPU lane width; all channel dims padded to this

# Weight-slab column offsets (all weights occupy rows [0:in_dim]).
_COL_W1 = 0            # (F, S)  conv of linear_1          -- input: bn1(x)
_COL_W22A = 128        # (F, S)  first conv of linear_22   -- input: x
_COL_WB = 256          # fused [w2 | w21 | w23], each padded to 128 lanes
_COL_W22B = 640        # (S, S)  second conv of linear_22
_COL_W3 = 768          # (S, C)  linear_3
_NUM_W_COLS = 896

# Row-slab row indices.
(_R_BN1G, _R_BN1B, _R_BN2G, _R_BN2B, _R_BN3G, _R_BN3B, _R_BN4G, _R_BN4B,
 _R_B1, _R_B22A, _R_B2, _R_B21, _R_B23, _R_B22B, _R_B3) = range(15)
_NUM_ROWS = 16


def _cnn6_kernel(x_ref, w_ref, r_ref, out_ref, *, eps):
  """x_ref: (B,128)  w_ref: (128,896)  r_ref: (16,128)  out_ref: (B,128)."""
  batch = x_ref.shape[0]
  inv_b = 1.0 / batch

  rows = r_ref[...]                                  # (16, 128), tiny

  def row(i):                                        # (1, 128) param row
    return rows[i:i + 1, :]

  def lrelu(v):                                      # LeakyReLU(0.2)
    return jnp.maximum(v, 0.2 * v)

  def bn(v, gi, bi):
    # Training-mode BatchNorm2d (H=W=1): per-channel batch stats, biased var.
    # Single pass: independent sum / sum-of-squares reductions.
    mean = jnp.sum(v, axis=0, keepdims=True) * inv_b
    msq = jnp.sum(v * v, axis=0, keepdims=True) * inv_b
    var = msq - mean * mean
    scale = row(gi) * lax.rsqrt(var + eps)           # (1,128)
    return v * scale + (row(bi) - mean * scale)

  def mm(a, col_lo, col_hi, bias_row):
    y = jnp.dot(a, w_ref[:, col_lo:col_hi], preferred_element_type=jnp.float32)
    return y + row(bias_row)

  x = x_ref[...]                                     # (B,128); lanes >=4 zero

  # linear_1: BN -> Conv1x1 -> LeakyReLU -> BN
  h = bn(x, _R_BN1G, _R_BN1B)
  h = lrelu(mm(h, _COL_W1, _COL_W1 + LANE, _R_B1))
  x1 = bn(h, _R_BN2G, _R_BN2B)                       # (B,128)

  # linear_22: Conv1x1(x) -> LeakyReLU -> BN -> Conv1x1 -> LeakyReLU -> Drop(0)
  c = lrelu(mm(x, _COL_W22A, _COL_W22A + LANE, _R_B22A))
  c = bn(c, _R_BN4G, _R_BN4B)
  c = lrelu(mm(c, _COL_W22B, _COL_W22B + LANE, _R_B22B))

  # Fused matmul for the three x1 consumers: [w2 | w21 | w23] -> (B, 384).
  yb = jnp.dot(x1, w_ref[:, _COL_WB:_COL_WB + 3 * LANE],
               preferred_element_type=jnp.float32)
  a = bn(lrelu(yb[:, 0:LANE] + row(_R_B2)), _R_BN3G, _R_BN3B)      # linear_2
  b = lrelu(yb[:, LANE:2 * LANE] + row(_R_B21))                    # linear_21
  x5 = lrelu(yb[:, 2 * LANE:3 * LANE] + row(_R_B23))               # linear_23

  x6 = a + b + c + x5                                # x2(+flatten) + x5

  # linear_3: Linear -> Tanh  (lane-dense (B,128) store; sliced outside)
  out_ref[...] = jnp.tanh(mm(x6, _COL_W3, _COL_W3 + LANE, _R_B3))


# ---------------------------------------------------------------------------
# Parameters (stored (in, out); PyTorch conv/linear weights would be transposed)
# ---------------------------------------------------------------------------
def init_params(key):
  ks = jax.random.split(key, 8)
  S, F, C = SCI_L_SECOND, L_FIRST, CLASSES
  return {
      "bn1_g": jnp.ones((F,), jnp.float32), "bn1_b": jnp.zeros((F,), jnp.float32),
      "w1": 0.1 * jax.random.normal(ks[0], (F, S), jnp.float32),
      "b1": jnp.zeros((S,), jnp.float32),
      "bn2_g": jnp.ones((S,), jnp.float32), "bn2_b": jnp.zeros((S,), jnp.float32),
      "w2": 0.1 * jax.random.normal(ks[1], (S, S), jnp.float32),
      "b2": jnp.zeros((S,), jnp.float32),
      "bn3_g": jnp.ones((S,), jnp.float32), "bn3_b": jnp.zeros((S,), jnp.float32),
      "w21": 0.1 * jax.random.normal(ks[2], (S, S), jnp.float32),
      "b21": jnp.zeros((S,), jnp.float32),
      "w22a": 0.1 * jax.random.normal(ks[3], (F, S), jnp.float32),
      "b22a": jnp.zeros((S,), jnp.float32),
      "bn4_g": jnp.ones((S,), jnp.float32), "bn4_b": jnp.zeros((S,), jnp.float32),
      "w22b": 0.1 * jax.random.normal(ks[4], (S, S), jnp.float32),
      "b22b": jnp.zeros((S,), jnp.float32),
      "w23": 0.1 * jax.random.normal(ks[5], (S, S), jnp.float32),
      "b23": jnp.zeros((S,), jnp.float32),
      "w3": 0.1 * jax.random.normal(ks[6], (S, C), jnp.float32),
      "b3": jnp.zeros((C,), jnp.float32),
  }


def pack_params(p):
  """Pack all parameters into two lane-dense slabs (done once, off-hot-path)."""
  F, S, C = L_FIRST, SCI_L_SECOND, CLASSES
  w = jnp.zeros((LANE, _NUM_W_COLS), jnp.float32)
  w = w.at[:F, _COL_W1:_COL_W1 + S].set(p["w1"])
  w = w.at[:F, _COL_W22A:_COL_W22A + S].set(p["w22a"])
  w = w.at[:S, _COL_WB:_COL_WB + S].set(p["w2"])
  w = w.at[:S, _COL_WB + LANE:_COL_WB + LANE + S].set(p["w21"])
  w = w.at[:S, _COL_WB + 2 * LANE:_COL_WB + 2 * LANE + S].set(p["w23"])
  w = w.at[:S, _COL_W22B:_COL_W22B + S].set(p["w22b"])
  w = w.at[:S, _COL_W3:_COL_W3 + C].set(p["w3"])

  r = jnp.zeros((_NUM_ROWS, LANE), jnp.float32)
  def setrow(r, i, v):
    v = v.reshape(-1)
    return r.at[i, :v.shape[0]].set(v)
  r = setrow(r, _R_BN1G, p["bn1_g"]); r = setrow(r, _R_BN1B, p["bn1_b"])
  r = setrow(r, _R_BN2G, p["bn2_g"]); r = setrow(r, _R_BN2B, p["bn2_b"])
  r = setrow(r, _R_BN3G, p["bn3_g"]); r = setrow(r, _R_BN3B, p["bn3_b"])
  r = setrow(r, _R_BN4G, p["bn4_g"]); r = setrow(r, _R_BN4B, p["bn4_b"])
  r = setrow(r, _R_B1, p["b1"]);      r = setrow(r, _R_B22A, p["b22a"])
  r = setrow(r, _R_B2, p["b2"]);      r = setrow(r, _R_B21, p["b21"])
  r = setrow(r, _R_B23, p["b23"]);    r = setrow(r, _R_B22B, p["b22b"])
  r = setrow(r, _R_B3, p["b3"])
  return w, r


@jax.jit
def cnn6_forward(x_nchw, w_slab, r_slab):
  # x_nchw: (B, L_FIRST, 1, 1) float32
  B = x_nchw.shape[0]
  x2d = x_nchw.reshape(B, L_FIRST)
  x_pad = jnp.zeros((B, LANE), jnp.float32).at[:, :L_FIRST].set(x2d)

  vmem = pl.BlockSpec(memory_space=pltpu.MemorySpace.VMEM)
  out_pad = pl.pallas_call(
      functools.partial(_cnn6_kernel, eps=SCI_BN_EPS),
      out_shape=jax.ShapeDtypeStruct((B, LANE), jnp.float32),
      in_specs=[vmem, vmem, vmem],
      out_specs=vmem,
  )(x_pad, w_slab, r_slab)
  # module returns (output, x)
  return out_pad[:, :CLASSES], x_nchw


# ---------------------------------------------------------------------------
# Pure-JAX reference (same training-mode BN semantics) for a sanity check.
# ---------------------------------------------------------------------------
def _reference_forward(x_nchw, p):
  B = x_nchw.shape[0]
  x = x_nchw.reshape(B, L_FIRST)

  def bn(v, g, b):
    mu = jnp.mean(v, axis=0, keepdims=True)
    var = jnp.mean((v - mu) ** 2, axis=0, keepdims=True)
    return g * (v - mu) * lax.rsqrt(var + SCI_BN_EPS) + b

  def lrelu(v):
    return jnp.where(v >= 0, v, 0.2 * v)

  h = lrelu(bn(x, p["bn1_g"], p["bn1_b"]) @ p["w1"] + p["b1"])
  x1 = bn(h, p["bn2_g"], p["bn2_b"])
  a = bn(lrelu(x1 @ p["w2"] + p["b2"]), p["bn3_g"], p["bn3_b"])
  b = lrelu(x1 @ p["w21"] + p["b21"])
  c = bn(lrelu(x @ p["w22a"] + p["b22a"]), p["bn4_g"], p["bn4_b"])
  c = lrelu(c @ p["w22b"] + p["b22b"])
  x5 = lrelu(x1 @ p["w23"] + p["b23"])
  return jnp.tanh((a + b + c + x5) @ p["w3"] + p["b3"])


if __name__ == "__main__":
  key = jax.random.PRNGKey(0)
  k_x, k_p = jax.random.split(key)
  x = jax.random.normal(k_x, (BATCH, L_FIRST, 1, 1), jnp.float32)
  params = init_params(k_p)
  w_slab, r_slab = pack_params(params)

  output, x_ret = cnn6_forward(x, w_slab, r_slab)
  jax.block_until_ready((output, x_ret))

  assert output.shape == (BATCH, CLASSES)
  assert x_ret.shape == (BATCH, L_FIRST, 1, 1)

  ref = _reference_forward(x, params)
  assert jnp.max(jnp.abs(output - ref)) < 2e-2, "kernel/reference mismatch"

  print("KERNEL_OK")
</pallas_src>

<mosaic_0001>
module attributes {stable_mosaic.version = 11 : i64} {
  func.func @_cnn6_kernel(%arg0: memref<2x128xf32, #tpu.memory_space<vmem>>, %arg1: memref<128x896xf32, #tpu.memory_space<vmem>>, %arg2: memref<16x128xf32, #tpu.memory_space<vmem>>, %arg3: memref<2x128xf32, #tpu.memory_space<vmem>>) attributes {dimension_semantics = [], scalar_prefetch = 0 : i64, scratch_operands = 0 : i64, tpu.core_type = #tpu.core_type<tc>} {
    %c0 = arith.constant 0 : index
    %c0_0 = arith.constant 0 : index
    %0 = vector.load %arg2[%c0, %c0_0] : memref<16x128xf32, #tpu.memory_space<vmem>>, vector<16x128xf32>
    %c0_1 = arith.constant 0 : index
    %c0_2 = arith.constant 0 : index
    %1 = vector.load %arg0[%c0_1, %c0_2] : memref<2x128xf32, #tpu.memory_space<vmem>>, vector<2x128xf32>
    %cst = arith.constant dense<0.000000e+00> : vector<128xf32>
    %2 = vector.multi_reduction <add>, %1, %cst [0] : vector<2x128xf32> to vector<128xf32>
    %3 = vector.shape_cast %2 : vector<128xf32> to vector<1x128xf32>
    %cst_3 = arith.constant 5.000000e-01 : f32
    %4 = vector.broadcast %cst_3 : f32 to vector<1x128xf32>
    %5 = arith.mulf %3, %4 : vector<1x128xf32>
    %6 = arith.mulf %1, %1 : vector<2x128xf32>
    %cst_4 = arith.constant dense<0.000000e+00> : vector<128xf32>
    %7 = vector.multi_reduction <add>, %6, %cst_4 [0] : vector<2x128xf32> to vector<128xf32>
    %8 = vector.shape_cast %7 : vector<128xf32> to vector<1x128xf32>
    %cst_5 = arith.constant 5.000000e-01 : f32
    %9 = vector.broadcast %cst_5 : f32 to vector<1x128xf32>
    %10 = arith.mulf %8, %9 : vector<1x128xf32>
    %11 = arith.mulf %5, %5 : vector<1x128xf32>
    %12 = arith.subf %10, %11 : vector<1x128xf32>
    %13 = vector.extract_strided_slice %0 {offsets = [0, 0], sizes = [1, 128], strides = [1, 1]} : vector<16x128xf32> to vector<1x128xf32>
    %cst_6 = arith.constant 9.99999974E-6 : f32
    %14 = vector.broadcast %cst_6 : f32 to vector<1x128xf32>
    %15 = arith.addf %12, %14 : vector<1x128xf32>
    %16 = math.rsqrt %15 : vector<1x128xf32>
    %17 = arith.mulf %13, %16 : vector<1x128xf32>
    %18 = vector.broadcast %17 : vector<1x128xf32> to vector<2x128xf32>
    %19 = arith.mulf %1, %18 : vector<2x128xf32>
    %20 = vector.extract_strided_slice %0 {offsets = [1, 0], sizes = [1, 128], strides = [1, 1]} : vector<16x128xf32> to vector<1x128xf32>
    %21 = arith.mulf %5, %17 : vector<1x128xf32>
    %22 = arith.subf %20, %21 : vector<1x128xf32>
    %23 = vector.broadcast %22 : vector<1x128xf32> to vector<2x128xf32>
    %24 = arith.addf %19, %23 : vector<2x128xf32>
    %c0_7 = arith.constant 0 : index
    %c0_8 = arith.constant 0 : index
    %25 = vector.load %arg1[%c0_7, %c0_8] : memref<128x896xf32, #tpu.memory_space<vmem>>, vector<128x128xf32>
    %cst_9 = arith.constant dense<0.000000e+00> : vector<2x128xf32>
    %26 = tpu.matmul %24, %25, %cst_9 {dimension_numbers = #tpu.dot_dimension_numbers<[1], [0], [0], [1], [0, 0, 1, 1], [], []>} : vector<2x128xf32>, vector<128x128xf32>, vector<2x128xf32> -> vector<2x128xf32>
    %27 = vector.extract_strided_slice %0 {offsets = [8, 0], sizes = [1, 128], strides = [1, 1]} : vector<16x128xf32> to vector<1x128xf32>
    %28 = vector.broadcast %27 : vector<1x128xf32> to vector<2x128xf32>
    %29 = arith.addf %26, %28 : vector<2x128xf32>
    %cst_10 = arith.constant 2.000000e-01 : f32
    %30 = vector.broadcast %cst_10 : f32 to vector<2x128xf32>
    %31 = arith.mulf %30, %29 : vector<2x128xf32>
    %32 = arith.maximumf %29, %31 : vector<2x128xf32>
    %cst_11 = arith.constant dense<0.000000e+00> : vector<128xf32>
    %33 = vector.multi_reduction <add>, %32, %cst_11 [0] : vector<2x128xf32> to vector<128xf32>
    %34 = vector.shape_cast %33 : vector<128xf32> to vector<1x128xf32>
    %cst_12 = arith.constant 5.000000e-01 : f32
    %35 = vector.broadcast %cst_12 : f32 to vector<1x128xf32>
    %36 = arith.mulf %34, %35 : vector<1x128xf32>
    %37 = arith.mulf %32, %32 : vector<2x128xf32>
    %cst_13 = arith.constant dense<0.000000e+00> : vector<128xf32>
    %38 = vector.multi_reduction <add>, %37, %cst_13 [0] : vector<2x128xf32> to vector<128xf32>
    %39 = vector.shape_cast %38 : vector<128xf32> to vector<1x128xf32>
    %cst_14 = arith.constant 5.000000e-01 : f32
    %40 = vector.broadcast %cst_14 : f32 to vector<1x128xf32>
    %41 = arith.mulf %39, %40 : vector<1x128xf32>
    %42 = arith.mulf %36, %36 : vector<1x128xf32>
    %43 = arith.subf %41, %42 : vector<1x128xf32>
    %44 = vector.extract_strided_slice %0 {offsets = [2, 0], sizes = [1, 128], strides = [1, 1]} : vector<16x128xf32> to vector<1x128xf32>
    %cst_15 = arith.constant 9.99999974E-6 : f32
    %45 = vector.broadcast %cst_15 : f32 to vector<1x128xf32>
    %46 = arith.addf %43, %45 : vector<1x128xf32>
    %47 = math.rsqrt %46 : vector<1x128xf32>
    %48 = arith.mulf %44, %47 : vector<1x128xf32>
    %49 = vector.broadcast %48 : vector<1x128xf32> to vector<2x128xf32>
    %50 = arith.mulf %32, %49 : vector<2x128xf32>
    %51 = vector.extract_strided_slice %0 {offsets = [3, 0], sizes = [1, 128], strides = [1, 1]} : vector<16x128xf32> to vector<1x128xf32>
    %52 = arith.mulf %36, %48 : vector<1x128xf32>
    %53 = arith.subf %51, %52 : vector<1x128xf32>
    %54 = vector.broadcast %53 : vector<1x128xf32> to vector<2x128xf32>
    %55 = arith.addf %50, %54 : vector<2x128xf32>
    %c0_16 = arith.constant 0 : index
    %c128 = arith.constant 128 : index
    %56 = vector.load %arg1[%c0_16, %c128] : memref<128x896xf32, #tpu.memory_space<vmem>>, vector<128x128xf32>
    %cst_17 = arith.constant dense<0.000000e+00> : vector<2x128xf32>
    %57 = tpu.matmul %1, %56, %cst_17 {dimension_numbers = #tpu.dot_dimension_numbers<[1], [0], [0], [1], [0, 0, 1, 1], [], []>} : vector<2x128xf32>, vector<128x128xf32>, vector<2x128xf32> -> vector<2x128xf32>
    %58 = vector.extract_strided_slice %0 {offsets = [9, 0], sizes = [1, 128], strides = [1, 1]} : vector<16x128xf32> to vector<1x128xf32>
    %59 = vector.broadcast %58 : vector<1x128xf32> to vector<2x128xf32>
    %60 = arith.addf %57, %59 : vector<2x128xf32>
    %cst_18 = arith.constant 2.000000e-01 : f32
    %61 = vector.broadcast %cst_18 : f32 to vector<2x128xf32>
    %62 = arith.mulf %61, %60 : vector<2x128xf32>
    %63 = arith.maximumf %60, %62 : vector<2x128xf32>
    %cst_19 = arith.constant dense<0.000000e+00> : vector<128xf32>
    %64 = vector.multi_reduction <add>, %63, %cst_19 [0] : vector<2x128xf32> to vector<128xf32>
    %65 = vector.shape_cast %64 : vector<128xf32> to vector<1x128xf32>
    %cst_20 = arith.constant 5.000000e-01 : f32
    %66 = vector.broadcast %cst_20 : f32 to vector<1x128xf32>
    %67 = arith.mulf %65, %66 : vector<1x128xf32>
    %68 = arith.mulf %63, %63 : vector<2x128xf32>
    %cst_21 = arith.constant dense<0.000000e+00> : vector<128xf32>
    %69 = vector.multi_reduction <add>, %68, %cst_21 [0] : vector<2x128xf32> to vector<128xf32>
    %70 = vector.shape_cast %69 : vector<128xf32> to vector<1x128xf32>
    %cst_22 = arith.constant 5.000000e-01 : f32
    %71 = vector.broadcast %cst_22 : f32 to vector<1x128xf32>
    %72 = arith.mulf %70, %71 : vector<1x128xf32>
    %73 = arith.mulf %67, %67 : vector<1x128xf32>
    %74 = arith.subf %72, %73 : vector<1x128xf32>
    %75 = vector.extract_strided_slice %0 {offsets = [6, 0], sizes = [1, 128], strides = [1, 1]} : vector<16x128xf32> to vector<1x128xf32>
    %cst_23 = arith.constant 9.99999974E-6 : f32
    %76 = vector.broadcast %cst_23 : f32 to vector<1x128xf32>
    %77 = arith.addf %74, %76 : vector<1x128xf32>
    %78 = math.rsqrt %77 : vector<1x128xf32>
    %79 = arith.mulf %75, %78 : vector<1x128xf32>
    %80 = vector.broadcast %79 : vector<1x128xf32> to vector<2x128xf32>
    %81 = arith.mulf %63, %80 : vector<2x128xf32>
    %82 = vector.extract_strided_slice %0 {offsets = [7, 0], sizes = [1, 128], strides = [1, 1]} : vector<16x128xf32> to vector<1x128xf32>
    %83 = arith.mulf %67, %79 : vector<1x128xf32>
    %84 = arith.subf %82, %83 : vector<1x128xf32>
    %85 = vector.broadcast %84 : vector<1x128xf32> to vector<2x128xf32>
    %86 = arith.addf %81, %85 : vector<2x128xf32>
    %c0_24 = arith.constant 0 : index
    %c640 = arith.constant 640 : index
    %87 = vector.load %arg1[%c0_24, %c640] : memref<128x896xf32, #tpu.memory_space<vmem>>, vector<128x128xf32>
    %cst_25 = arith.constant dense<0.000000e+00> : vector<2x128xf32>
    %88 = tpu.matmul %86, %87, %cst_25 {dimension_numbers = #tpu.dot_dimension_numbers<[1], [0], [0], [1], [0, 0, 1, 1], [], []>} : vector<2x128xf32>, vector<128x128xf32>, vector<2x128xf32> -> vector<2x128xf32>
    %89 = vector.extract_strided_slice %0 {offsets = [13, 0], sizes = [1, 128], strides = [1, 1]} : vector<16x128xf32> to vector<1x128xf32>
    %90 = vector.broadcast %89 : vector<1x128xf32> to vector<2x128xf32>
    %91 = arith.addf %88, %90 : vector<2x128xf32>
    %cst_26 = arith.constant 2.000000e-01 : f32
    %92 = vector.broadcast %cst_26 : f32 to vector<2x128xf32>
    %93 = arith.mulf %92, %91 : vector<2x128xf32>
    %94 = arith.maximumf %91, %93 : vector<2x128xf32>
    %c0_27 = arith.constant 0 : index
    %c256 = arith.constant 256 : index
    %95 = vector.load %arg1[%c0_27, %c256] : memref<128x896xf32, #tpu.memory_space<vmem>>, vector<128x384xf32>
    %cst_28 = arith.constant dense<0.000000e+00> : vector<2x384xf32>
    %96 = tpu.matmul %55, %95, %cst_28 {dimension_numbers = #tpu.dot_dimension_numbers<[1], [0], [0], [1], [0, 0, 1, 1], [], []>} : vector<2x128xf32>, vector<128x384xf32>, vector<2x384xf32> -> vector<2x384xf32>
    %97 = vector.extract_strided_slice %96 {offsets = [0, 0], sizes = [2, 128], strides = [1, 1]} : vector<2x384xf32> to vector<2x128xf32>
    %98 = vector.extract_strided_slice %0 {offsets = [10, 0], sizes = [1, 128], strides = [1, 1]} : vector<16x128xf32> to vector<1x128xf32>
    %99 = vector.broadcast %98 : vector<1x128xf32> to vector<2x128xf32>
    %100 = arith.addf %97, %99 : vector<2x128xf32>
    %cst_29 = arith.constant 2.000000e-01 : f32
    %101 = vector.broadcast %cst_29 : f32 to vector<2x128xf32>
    %102 = arith.mulf %101, %100 : vector<2x128xf32>
    %103 = arith.maximumf %100, %102 : vector<2x128xf32>
    %cst_30 = arith.constant dense<0.000000e+00> : vector<128xf32>
    %104 = vector.multi_reduction <add>, %103, %cst_30 [0] : vector<2x128xf32> to vector<128xf32>
    %105 = vector.shape_cast %104 : vector<128xf32> to vector<1x128xf32>
    %cst_31 = arith.constant 5.000000e-01 : f32
    %106 = vector.broadcast %cst_31 : f32 to vector<1x128xf32>
    %107 = arith.mulf %105, %106 : vector<1x128xf32>
    %108 = arith.mulf %103, %103 : vector<2x128xf32>
    %cst_32 = arith.constant dense<0.000000e+00> : vector<128xf32>
    %109 = vector.multi_reduction <add>, %108, %cst_32 [0] : vector<2x128xf32> to vector<128xf32>
    %110 = vector.shape_cast %109 : vector<128xf32> to vector<1x128xf32>
    %cst_33 = arith.constant 5.000000e-01 : f32
    %111 = vector.broadcast %cst_33 : f32 to vector<1x128xf32>
    %112 = arith.mulf %110, %111 : vector<1x128xf32>
    %113 = arith.mulf %107, %107 : vector<1x128xf32>
    %114 = arith.subf %112, %113 : vector<1x128xf32>
    %115 = vector.extract_strided_slice %0 {offsets = [4, 0], sizes = [1, 128], strides = [1, 1]} : vector<16x128xf32> to vector<1x128xf32>
    %cst_34 = arith.constant 9.99999974E-6 : f32
    %116 = vector.broadcast %cst_34 : f32 to vector<1x128xf32>
    %117 = arith.addf %114, %116 : vector<1x128xf32>
    %118 = math.rsqrt %117 : vector<1x128xf32>
    %119 = arith.mulf %115, %118 : vector<1x128xf32>
    %120 = vector.broadcast %119 : vector<1x128xf32> to vector<2x128xf32>
    %121 = arith.mulf %103, %120 : vector<2x128xf32>
    %122 = vector.extract_strided_slice %0 {offsets = [5, 0], sizes = [1, 128], strides = [1, 1]} : vector<16x128xf32> to vector<1x128xf32>
    %123 = arith.mulf %107, %119 : vector<1x128xf32>
    %124 = arith.subf %122, %123 : vector<1x128xf32>
    %125 = vector.broadcast %124 : vector<1x128xf32> to vector<2x128xf32>
    %126 = arith.addf %121, %125 : vector<2x128xf32>
    %127 = vector.extract_strided_slice %96 {offsets = [0, 128], sizes = [2, 128], strides = [1, 1]} : vector<2x384xf32> to vector<2x128xf32>
    %128 = vector.extract_strided_slice %0 {offsets = [11, 0], sizes = [1, 128], strides = [1, 1]} : vector<16x128xf32> to vector<1x128xf32>
    %129 = vector.broadcast %128 : vector<1x128xf32> to vector<2x128xf32>
    %130 = arith.addf %127, %129 : vector<2x128xf32>
    %cst_35 = arith.constant 2.000000e-01 : f32
    %131 = vector.broadcast %cst_35 : f32 to vector<2x128xf32>
    %132 = arith.mulf %131, %130 : vector<2x128xf32>
    %133 = arith.maximumf %130, %132 : vector<2x128xf32>
    %134 = vector.extract_strided_slice %96 {offsets = [0, 256], sizes = [2, 128], strides = [1, 1]} : vector<2x384xf32> to vector<2x128xf32>
    %135 = vector.extract_strided_slice %0 {offsets = [12, 0], sizes = [1, 128], strides = [1, 1]} : vector<16x128xf32> to vector<1x128xf32>
    %136 = vector.broadcast %135 : vector<1x128xf32> to vector<2x128xf32>
    %137 = arith.addf %134, %136 : vector<2x128xf32>
    %cst_36 = arith.constant 2.000000e-01 : f32
    %138 = vector.broadcast %cst_36 : f32 to vector<2x128xf32>
    %139 = arith.mulf %138, %137 : vector<2x128xf32>
    %140 = arith.maximumf %137, %139 : vector<2x128xf32>
    %141 = arith.addf %126, %133 : vector<2x128xf32>
    %142 = arith.addf %141, %94 : vector<2x128xf32>
    %143 = arith.addf %142, %140 : vector<2x128xf32>
    %c0_37 = arith.constant 0 : index
    %c768 = arith.constant 768 : index
    %144 = vector.load %arg1[%c0_37, %c768] : memref<128x896xf32, #tpu.memory_space<vmem>>, vector<128x128xf32>
    %cst_38 = arith.constant dense<0.000000e+00> : vector<2x128xf32>
    %145 = tpu.matmul %143, %144, %cst_38 {dimension_numbers = #tpu.dot_dimension_numbers<[1], [0], [0], [1], [0, 0, 1, 1], [], []>} : vector<2x128xf32>, vector<128x128xf32>, vector<2x128xf32> -> vector<2x128xf32>
    %146 = vector.extract_strided_slice %0 {offsets = [14, 0], sizes = [1, 128], strides = [1, 1]} : vector<16x128xf32> to vector<1x128xf32>
    %147 = vector.broadcast %146 : vector<1x128xf32> to vector<2x128xf32>
    %148 = arith.addf %145, %147 : vector<2x128xf32>
    %149 = math.tanh %148 : vector<2x128xf32>
    %c0_39 = arith.constant 0 : index
    %c0_40 = arith.constant 0 : index
    %150 = vector.load %arg3[%c0_39, %c0_40] : memref<2x128xf32, #tpu.memory_space<vmem>>, vector<2x128xf32>
    tpu.vector_store %arg3[%c0_39, %c0_40], %149 {strides = array<i32>} : memref<2x128xf32, #tpu.memory_space<vmem>>, vector<2x128xf32>,
    return
  }
}

</mosaic_0001>

<bundles_post_ra>
// kernel: cnn6_forward.1
= control target key start
LH: loop header
LB: loop body
LE: loop exit
PB: predicated region body
PF: predicated region fallthrough
CT: control target
= control target key end

     0   :  { %8 = vsyncpa [#allocation3], 0  ;;  %s711_s0 = inlined_call_operand.vmem [shape: f32[2,128], index: 0, kind: input, shape index: {}]   ;;  %s712_s1 = inlined_call_operand.hbm [shape: f32[128,896], index: 1, kind: input, shape index: {}]   ;;  %s713_s2 = inlined_call_operand.hbm [shape: f32[16,128], index: 2, kind: input, shape index: {}]   ;;  %s714_s3 = inlined_call_operand.hbm [shape: f32[2,128], index: 3, kind: output, shape index: {}]  }
   0x1   :  { %9 = vsyncpa [#allocation6], 0 }
   0x2   :  { %10 = vsyncpa [#allocation4], 0  ;;  %s17_s14 = sshll.u32 %s712_s1, 4  ;;  %s603_s15 = smov [#allocation2]   ;;  %s18_s14 = int_to_ptr.hbm [resolvable:$true] %s17_s14 }
   0x3   :  { %s19_s16 = sshll.u32 %s603_s15, 4  ;;  %s30_s19 = sshll.u32 %s713_s2, 4  ;;  %s20_s16 = int_to_ptr.vmem [resolvable:$true] %s19_s16  ;;  %s31_s19 = int_to_ptr.hbm [resolvable:$true] %s30_s19 }
   0x4   :  { %s604_s20 = smov 896   ;;  %s605_s21 = smov 56  }
   0x5   :  { %25 = dma.hbm_to_vmem [thread:$0]  %s18_s14, 14336, %s20_s16, [#allocation3], %s604_s20, %s604_s20, %s605_s21  }
   0x6   :  { %s606_s22 = smov [#allocation5]   ;;  %s607_s24 = smov 128  }
   0x7   :  { %s32_s23 = sshll.u32 %s606_s22, 4  ;;  %s608_s25 = smov 8   ;;  %s33_s23 = int_to_ptr.vmem [resolvable:$true] %s32_s23 }
   0x8   :  { %38 = dma.hbm_to_vmem [thread:$0]  %s31_s19, 256, %s33_s23, [#allocation6], %s607_s24, %s607_s24, %s608_s25  }
   0x9   :  { %597 = dma.done.wait [#allocation3], 14336  }
   0xa   :  { %598 = vsyncadd [#allocation3], 4294952960 }
   0xb   :  { %599 = dma.done.wait [#allocation6], 256  }
   0xc   :  { %600 = vsyncadd [#allocation6], 4294967040  ;;  %v106_v0 = vld [vmem:[#allocation2 + $0x348] sm:$0xff]  ;;  %v105_v1 = vld [vmem:[#allocation2 + $0x310] sm:$0xff]  ;;  %vm50_vm0 = vcmask 1041408   ;;  %s497_s29 = sshll.u32 %s714_s3, 4  ;;  %s498_s29 = int_to_ptr.hbm [resolvable:$true] %s497_s29 }
   0xd   :  { %v185_v2 = vld [vmem:[#allocation2 + $0x350] sm:$0xff]  ;;  %108 = vmatpush.msra.mxu0 %v106_v0  ;;  %v184_v3 = vld [vmem:[#allocation2 + $0x318] sm:$0xff]  ;;  %v183_v5 = vld [vmem:[#allocation2 + $0x2e0] sm:$0xff] }
   0xe   :  { %187 = vmatpush.msra.mxu1 %v185_v2  ;;  %v104_v4 = vld [vmem:[#allocation2 + $0x2d8] sm:$0xff]  ;;  %v103_v6 = vld [vmem:[#allocation2 + $0x2a0] sm:$0xff]  ;;  %v182_v7 = vld [vmem:[#allocation2 + $0x2a8] sm:$0xff] }
   0xf   :  { %109 = vmatpush.msra.mxu0 %v105_v1  ;;  %v102_v8 = vld [vmem:[#allocation2 + $0x268] sm:$0xff]  ;;  %v181_v9 = vld [vmem:[#allocation2 + $0x270] sm:$0xff]  ;;  %v180_v11 = vld [vmem:[#allocation2 + $0x238] sm:$0xff] }
  0x10   :  { %188 = vmatpush.msra.mxu1 %v184_v3  ;;  %v101_v10 = vld [vmem:[#allocation2 + $0x230] sm:$0xff]  ;;  %v100_v12 = vld [vmem:[#allocation2 + $0x1f8] sm:$0xff]  ;;  %v179_v13 = vld [vmem:[#allocation2 + $0x200] sm:$0xff] }
  0x11   :  { %110 = vmatpush.msra.mxu0 %v104_v4  ;;  %v639_v14 = vld [vmem:[%s711_s0] sm:$0x3]  ;;  %v178_v18 = vld [vmem:[#allocation2 + $0x1c8] sm:$0xff]  ;;  %v177_v22 = vld [vmem:[#allocation2 + $0x190] sm:$0xff]  ;;  %s609_s0 = smov [#allocation7]  }
  0x12   :  { %189 = vmatpush.msra.mxu1 %v183_v5  ;;  %v51_v15 = vsel %vm50_vm0, %v639_v14, 0.0  ;;  %v59_v16 = vmul.f32 %v639_v14, %v639_v14  ;;  %v99_v17 = vld [vmem:[#allocation2 + $0x1c0] sm:$0xff]  ;;  %v98_v21 = vld [vmem:[#allocation2 + $0x188] sm:$0xff]  ;;  %v97_v25 = vld [vmem:[#allocation2 + $0x150] sm:$0xff]  ;;  %s495_s26 = sshll.u32 %s609_s0, 4  ;;  %s496_s26 = int_to_ptr.vmem [resolvable:$true] %s495_s26 }
  0x13   :  { %111 = vmatpush.msra.mxu0 %v103_v6  ;;  %v52_v19 = vrot.slane %v51_v15, 4  ;;  %v176_v26 = vld [vmem:[#allocation2 + $0x158] sm:$0xff]  ;;  %v175_v30 = vld [vmem:[#allocation2 + $0x120] sm:$0xff]  ;;  %v174_v34 = vld [vmem:[#allocation2 + $0xe8] sm:$0xff] }
  0x14   :  { %190 = vmatpush.msra.mxu1 %v182_v7  ;;  %v60_v20 = vsel %vm50_vm0, %v59_v16, 0.0  ;;  %v96_v29 = vld [vmem:[#allocation2 + $0x118] sm:$0xff]  ;;  %v95_v33 = vld [vmem:[#allocation2 + $0xe0] sm:$0xff]  ;;  %v94_v37 = vld [vmem:[#allocation2 + $0xa8] sm:$0xff] }
  0x15   :  { %112 = vmatpush.msra.mxu0 %v102_v8  ;;  %v53_v23 = vadd.f32 %v52_v19, %v51_v15  ;;  %v61_v24 = vrot.slane %v60_v20, 4  ;;  %v173_v38 = vld [vmem:[#allocation2 + $0xb0] sm:$0xff]  ;;  %v172_v42 = vld [vmem:[#allocation2 + $0x78] sm:$0xff]  ;;  %v171_v46 = vld [vmem:[#allocation2 + $0x40] sm:$0xff] }
  0x16   :  { %191 = vmatpush.msra.mxu1 %v181_v9  ;;  %v93_v41 = vld [vmem:[#allocation2 + $0x70] sm:$0xff]  ;;  %v92_v45 = vld [vmem:[#allocation2 + $0x38] sm:$0xff]  ;;  %v91_v49 = vld [vmem:[#allocation2] sm:$0xff] }
  0x17   :  { %113 = vmatpush.msra.mxu0 %v101_v10  ;;  %v54_v27 = vrot.slane %v53_v23, 2  ;;  %v62_v28 = vadd.f32 %v61_v24, %v60_v20  ;;  %v170_v52 = vld [vmem:[#allocation2 + $0x8] sm:$0xff]  ;;  %v647_v58 = vld [vmem:[#allocation5] sm:$0xff] }
  0x18   :  { %192 = vmatpush.msra.mxu1 %v180_v11  ;;  %v652_v5 = vld [vmem:[#allocation5 + $0x8] sm:$0xff] }
  0x19   :  { %114 = vmatpush.msra.mxu0 %v100_v12  ;;  %v55_v31 = vadd.f32 %v54_v27, %v53_v23  ;;  %v63_v32 = vrot.slane %v62_v28, 2  ;;  %v186_v6 = vperm.slane %v652_v5, 1  ;;  %v334_v27 = vld [vmem:[#allocation2 + $0x360] sm:$0xff] }
  0x1a   :  { %193 = vmatpush.msra.mxu1 %v179_v13 }
  0x1b   :  { %115 = vmatpush.msra.mxu0 %v99_v17  ;;  %v56_v35 = vrot.slane %v55_v31, 1  ;;  %v64_v36 = vadd.f32 %v63_v32, %v62_v28  ;;  %v335_v28 = vld [vmem:[#allocation2 + $0x368] sm:$0xff] }
  0x1c   :  { %194 = vmatpush.msra.mxu1 %v178_v18 }
  0x1d   :  { %116 = vmatpush.msra.mxu0 %v98_v21  ;;  %v57_v39 = vadd.f32 %v56_v35, %v55_v31  ;;  %v65_v40 = vrot.slane %v64_v36, 1  ;;  %v331_v31 = vld [vmem:[#allocation2 + $0x328] sm:$0xff] }
  0x1e   :  { %195 = vmatpush.msra.mxu1 %v177_v22  ;;  %v327_v35 = vld [vmem:[#allocation2 + $0x2e8] sm:$0xff] }
  0x1f   :  { %117 = vmatpush.msra.mxu0 %v97_v25  ;;  %v58_v43 = vmul.f32 0.5, %v57_v39  ;;  %v66_v44 = vadd.f32 %v65_v40, %v64_v36  ;;  %v328_v36 = vld [vmem:[#allocation2 + $0x2f0] sm:$0xff] }
  0x20   :  { %196 = vmatpush.msra.mxu1 %v176_v26  ;;  %v333_v26 = vld [vmem:[#allocation2 + $0x358] sm:$0xff] }
  0x21   :  { %118 = vmatpush.msra.mxu0 %v96_v29  ;;  %v67_v47 = vmul.f32 0.5, %v66_v44  ;;  %v68_v48 = vmul.f32 %v58_v43, %v58_v43  ;;  %336 = vmatpush.msra.mxu3 %v333_v26  ;;  %v264_v29 = vld [vmem:[#allocation2 + $0x370] sm:$0xff]  ;;  %v261_v44 = vld [vmem:[#allocation2 + $0x2c8] sm:$0xff] }
  0x22   :  { %197 = vmatpush.msra.mxu1 %v175_v30  ;;  %v330_v30 = vld [vmem:[#allocation2 + $0x320] sm:$0xff]  ;;  %266 = vmatpush.msra.mxu2 %v264_v29  ;;  %v301_v29 = vld [vmem:[#allocation2 + $0xf8] sm:$0xff] }
  0x23   :  { %119 = vmatpush.msra.mxu0 %v95_v33  ;;  %v69_v50 = vsub.f32 %v67_v47, %v68_v48  ;;  %v332_v33 = vld [vmem:[#allocation2 + $0x330] sm:$0xff]  ;;  %337 = vmatpush.msra.mxu3 %v330_v30  ;;  %v322_v47 = vld [vmem:[#allocation2 + $0x280] sm:$0xff]  ;;  %v107_v48 = vperm.slane %v652_v5, 0 }
  0x24   :  { %198 = vmatpush.msra.mxu1 %v174_v34  ;;  %v263_v34 = vld [vmem:[#allocation2 + $0x338] sm:$0xff] }
  0x25   :  { %120 = vmatpush.msra.mxu0 %v94_v37  ;;  %v70_v51 = vadd.f32 1e-05, %v69_v50  ;;  %v329_v37 = vld [vmem:[#allocation2 + $0x2f8] sm:$0xff]  ;;  %267 = vmatpush.msra.mxu2 %v263_v34  ;;  %v260_v50 = vld [vmem:[#allocation2 + $0x290] sm:$0xff] }
  0x26   :  { %199 = vmatpush.msra.mxu1 %v173_v38  ;;  %v262_v38 = vld [vmem:[#allocation2 + $0x300] sm:$0xff]  ;;  %338 = vmatpush.msra.mxu3 %v327_v35 }
  0x27   :  { %121 = vmatpush.msra.mxu0 %v93_v41  ;;  %515 = vrsqrt.f32 %v70_v51  ;;  %vm77_vm1 = vweird.f32 %v70_v51  ;;  %v324_v41 = vld [vmem:[#allocation2 + $0x2b0] sm:$0xff]  ;;  %268 = vmatpush.msra.mxu2 %v262_v38 }
  0x28   :  { %200 = vmatpush.msra.mxu1 %v172_v42  ;;  %v325_v42 = vld [vmem:[#allocation2 + $0x2b8] sm:$0xff]  ;;  %339 = vmatpush.msra.mxu3 %v324_v41 }
  0x29   :  { %122 = vmatpush.msra.mxu0 %v92_v45  ;;  %269 = vmatpush.msra.mxu2 %v261_v44  ;;  %v295_v44 = vld [vmem:[#allocation2 + $0x88] sm:$0xff] }
  0x2a   :  { %201 = vmatpush.msra.mxu1 %v171_v46  ;;  %v321_v46 = vld [vmem:[#allocation2 + $0x278] sm:$0xff] }
  0x2b   :  { %123 = vmatpush.msra.mxu0 %v91_v49  ;;  %v323_v49 = vld [vmem:[#allocation2 + $0x288] sm:$0xff]  ;;  %340 = vmatpush.msra.mxu3 %v321_v46  ;;  %v296_v46 = vld [vmem:[#allocation2 + $0x90] sm:$0xff] }
  0x2c   :  { %202 = vmatpush.msra.mxu1 %v170_v52  ;;  %v318_v52 = vld [vmem:[#allocation2 + $0x240] sm:$0xff]  ;;  %270 = vmatpush.msra.mxu2 %v260_v50  ;;  %v291_v50 = vld [vmem:[#allocation2 + $0x48] sm:$0xff] }
  0x2d   :  { %203 = vmatmul.f32.vlgmr.msra.gmra.mxu1 %v639_v14  ;;  %v516_v53 = vpop.eup %515  ;;  %356 = vmatpush.msrb.mxu0 %v334_v27 }
  0x2e   :  { %v72_v54 = vmul.f32 %v516_v53, %v70_v51  ;;  %vm78_vm2 = vweird.f32 %v516_v53  ;;  %376 = vmatpush.msrb.mxu1 %v335_v28  ;;  %341 = vmatpush.msra.mxu3 %v318_v52  ;;  %v300_v28 = vld [vmem:[#allocation2 + $0xf0] sm:$0xff] }
  0x2f   :  { %vm79_vm3 = vmor %vm77_vm1, %vm78_vm2  ;;  %357 = vmatpush.msrb.mxu0 %v331_v31  ;;  %v302_v31 = vld [vmem:[#allocation2 + $0x100] sm:$0xff]  ;;  %v292_v52 = vld [vmem:[#allocation2 + $0x50] sm:$0xff] }
  0x30   :  { %v73_v55 = vmul.f32 %v516_v53, %v72_v54  ;;  %377 = vmatpush.msrb.mxu1 %v332_v33  ;;  %v320_v54 = vld [vmem:[#allocation2 + $0x250] sm:$0xff]  ;;  %v253_v33 = vld [vmem:[#allocation2 + $0x108] sm:$0xff] }
  0x31   :  { %358 = vmatpush.msrb.mxu0 %v328_v36  ;;  %v297_v36 = vld [vmem:[#allocation2 + $0xb8] sm:$0xff] }
  0x32   :  { %v74_v56 = vmul.f32 0.5, %v73_v55  ;;  %378 = vmatpush.msrb.mxu1 %v329_v37  ;;  %v259_v55 = vld [vmem:[#allocation2 + $0x258] sm:$0xff]  ;;  %v298_v37 = vld [vmem:[#allocation2 + $0xc0] sm:$0xff] }
  0x33   :  { %359 = vmatpush.msrb.mxu0 %v325_v42  ;;  %271 = vmatpush.msra.mxu2 %v259_v55 }
  0x34   :  { %v75_v57 = vsub.f32 1.5, %v74_v56 }
  0x35   :  { %360 = vmatpush.msrb.mxu0 %v322_v47  ;;  %v251_v47 = vld [vmem:[#allocation2 + $0x98] sm:$0xff] }
  0x36   :  { %v76_v59 = vmul.f32 %v516_v53, %v75_v57  ;;  %v315_v57 = vld [vmem:[#allocation2 + $0x208] sm:$0xff] }
  0x37   :  { %342 = vmatpush.msra.mxu3 %v315_v57  ;;  %v289_v57 = vld [vmem:[#allocation2 + $0x18] sm:$0xff] }
  0x38   :  { %v80_v60 = vsel %vm79_vm3, %v516_v53, %v76_v59  ;;  %v319_v53 = vld [vmem:[#allocation2 + $0x248] sm:$0xff]  ;;  %v316_v59 = vld [vmem:[#allocation2 + $0x210] sm:$0xff] }
  0x39   :  { %v81_v61 = vmul.f32 %v80_v60, %v647_v58  ;;  %361 = vmatpush.msrb.mxu0 %v319_v53  ;;  %v293_v53 = vld [vmem:[#allocation2 + $0x58] sm:$0xff] }
  0x3b   :  { %v82_v62 = vperm.slane %v81_v61, 0  ;;  %v84_v63 = vmul.f32 %v81_v61, %v58_v43  ;;  %v326_v43 = vld [vmem:[#allocation2 + $0x2c0] sm:$0xff]  ;;  %v317_v61 = vld [vmem:[#allocation2 + $0x218] sm:$0xff]  ;;  %362 = vmatpush.msrb.mxu0 %v316_v59 }
  0x3c   :  { %379 = vmatpush.msrb.mxu1 %v326_v43  ;;  %v294_v43 = vld [vmem:[#allocation2 + $0x80] sm:$0xff] }
  0x3d   :  { %v86_v0 = vrot.slane %v84_v63, 7  ;;  %v83_v1 = vmul.f32 %v82_v62, %v639_v14  ;;  %v258_v62 = vld [vmem:[#allocation2 + $0x220] sm:$0xff]  ;;  %v312_v63 = vld [vmem:[#allocation2 + $0x1d0] sm:$0xff] }
  0x3e   :  { %380 = vmatpush.msrb.mxu1 %v323_v49  ;;  %272 = vmatpush.msra.mxu2 %v258_v62 }
  0x3f   :  { %v88_v2 = vsub.f32 %v647_v58, %v86_v0  ;;  %v313_v0 = vld [vmem:[#allocation2 + $0x1d8] sm:$0xff]  ;;  %343 = vmatpush.msra.mxu3 %v312_v63 }
  0x40   :  { %381 = vmatpush.msrb.mxu1 %v320_v54  ;;  %363 = vmatpush.msrb.mxu0 %v313_v0  ;;  %v250_v54 = vld [vmem:[#allocation2 + $0x60] sm:$0xff] }
  0x41   :  { %v89_v3 = vperm.slane %v88_v2, 1  ;;  %v314_v2 = vld [vmem:[#allocation2 + $0x1e0] sm:$0xff] }
  0x42   :  { %382 = vmatpush.msrb.mxu1 %v317_v61  ;;  %v290_v61 = vld [vmem:[#allocation2 + $0x20] sm:$0xff] }
  0x43   :  { %v90_v4 = vadd.f32 %v89_v3, %v83_v1  ;;  %v257_v3 = vld [vmem:[#allocation2 + $0x1e8] sm:$0xff] }
  0x44   :  { %383 = vmatpush.msrb.mxu1 %v314_v2  ;;  %273 = vmatpush.msra.mxu2 %v257_v3 }
  0x45   :  { %124 = vmatmul.f32.vlgmr.msra.gmra.mxu0 %v90_v4  ;;  %v309_v4 = vld [vmem:[#allocation2 + $0x198] sm:$0xff] }
  0x46   :  { %344 = vmatpush.msra.mxu3 %v309_v4 }
  0xaa   :  { %v204_v7 = vpop.f32.mrf.mxu1 }
  0xab   :  { %v205_v8 = vadd.f32 %v204_v7, %v186_v6  ;;  %v310_v6 = vld [vmem:[#allocation2 + $0x1a0] sm:$0xff] }
  0xac   :  { %364 = vmatpush.msrb.mxu0 %v310_v6 }
  0xad   :  { %v207_v9 = vmul.f32 0.2, %v205_v8 }
  0xaf   :  { %v655_v10 = vmax.f32 %v205_v8, %v207_v9  ;;  %v311_v9 = vld [vmem:[#allocation2 + $0x1a8] sm:$0xff] }
  0xb0   :  { %384 = vmatpush.msrb.mxu1 %v311_v9 }
  0xb1   :  { %v209_v11 = vsel %vm50_vm0, %v655_v10, 0.0  ;;  %v217_v12 = vmul.f32 %v655_v10, %v655_v10 }
  0xb2   :  { %v210_v13 = vrot.slane %v209_v11, 4 }
  0xb3   :  { %v218_v14 = vsel %vm50_vm0, %v217_v12, 0.0  ;;  %v306_v12 = vld [vmem:[#allocation2 + $0x160] sm:$0xff] }
  0xb4   :  { %v211_v15 = vadd.f32 %v210_v13, %v209_v11  ;;  %v219_v16 = vrot.slane %v218_v14, 4  ;;  %v256_v11 = vld [vmem:[#allocation2 + $0x1b0] sm:$0xff]  ;;  %v307_v13 = vld [vmem:[#allocation2 + $0x168] sm:$0xff]  ;;  %345 = vmatpush.msra.mxu3 %v306_v12 }
  0xb5   :  { %274 = vmatpush.msra.mxu2 %v256_v11  ;;  %365 = vmatpush.msrb.mxu0 %v307_v13  ;;  %v249_v13 = vld [vmem:[#allocation2 + $0x28] sm:$0xff] }
  0xb6   :  { %v212_v17 = vrot.slane %v211_v15, 2  ;;  %v220_v18 = vadd.f32 %v219_v16, %v218_v14 }
  0xb8   :  { %v213_v19 = vadd.f32 %v212_v17, %v211_v15  ;;  %v221_v20 = vrot.slane %v220_v18, 2  ;;  %v308_v17 = vld [vmem:[#allocation2 + $0x170] sm:$0xff] }
  0xb9   :  { %385 = vmatpush.msrb.mxu1 %v308_v17 }
  0xba   :  { %v222_v21 = vadd.f32 %v221_v20, %v220_v18  ;;  %v214_v22 = vrot.slane %v213_v19, 1  ;;  %v255_v18 = vld [vmem:[#allocation2 + $0x178] sm:$0xff]  ;;  %v303_v20 = vld [vmem:[#allocation2 + $0x128] sm:$0xff] }
  0xbb   :  { %275 = vmatpush.msra.mxu2 %v255_v18  ;;  %346 = vmatpush.msra.mxu3 %v303_v20 }
  0xbc   :  { %v223_v23 = vrot.slane %v222_v21, 1  ;;  %v215_v24 = vadd.f32 %v214_v22, %v213_v19 }
  0xbd   :  { %347 = vmatpush.msra.mxu3 %v300_v28  ;;  %v396_v28 = vperm.slane %v652_v5, 2 }
  0xbe   :  { %v224_v25 = vadd.f32 %v223_v23, %v222_v21  ;;  %v662_v32 = vmul.f32 0.5, %v215_v24  ;;  %v304_v21 = vld [vmem:[#allocation2 + $0x130] sm:$0xff]  ;;  %v305_v24 = vld [vmem:[#allocation2 + $0x138] sm:$0xff] }
  0xbf   :  { %366 = vmatpush.msrb.mxu0 %v304_v21  ;;  %386 = vmatpush.msrb.mxu1 %v305_v24 }
  0xc0   :  { %v225_v39 = vmul.f32 0.5, %v224_v25  ;;  %v226_v40 = vmul.f32 %v662_v32, %v662_v32  ;;  %v254_v25 = vld [vmem:[#allocation2 + $0x140] sm:$0xff]  ;;  %348 = vmatpush.msra.mxu3 %v297_v36  ;;  %v464_v36 = vld [vmem:[#allocation2 + $0x308] sm:$0xff] }
  0xc1   :  { %276 = vmatpush.msra.mxu2 %v254_v25  ;;  %367 = vmatpush.msrb.mxu0 %v301_v29 }
  0xc2   :  { %v227_v45 = vsub.f32 %v225_v39, %v226_v40  ;;  %v125_v56 = vpop.f32.mrf.mxu0  ;;  %v299_v39 = vld [vmem:[#allocation2 + $0xc8] sm:$0xff]  ;;  %v252_v40 = vld [vmem:[#allocation2 + $0xd0] sm:$0xff]  ;;  %387 = vmatpush.msrb.mxu1 %v302_v31  ;;  %349 = vmatpush.msra.mxu3 %v294_v43  ;;  %v466_v31 = vld [vmem:[#allocation2 + $0x378] sm:$0xff] }
  0xc3   :  { %v126_v60 = vadd.f32 %v125_v56, %v107_v48  ;;  %277 = vmatpush.msra.mxu2 %v253_v33  ;;  %368 = vmatpush.msrb.mxu0 %v298_v37  ;;  %v288_v56 = vld [vmem:[#allocation2 + $0x10] sm:$0xff] }
  0xc4   :  { %v667_v51 = vadd.f32 1e-05, %v227_v45  ;;  %388 = vmatpush.msrb.mxu1 %v299_v39  ;;  %350 = vmatpush.msra.mxu3 %v291_v50  ;;  %v459_v50 = vld [vmem:[#allocation2 + $0x1f0] sm:$0xff] }
  0xc5   :  { %v128_v1 = vmul.f32 0.2, %v126_v60  ;;  %278 = vmatpush.msra.mxu2 %v252_v40  ;;  %369 = vmatpush.msrb.mxu0 %v295_v44  ;;  %v461_v44 = vld [vmem:[#allocation2 + $0x260] sm:$0xff] }
  0xc6   :  { %517 = vrsqrt.f32 %v667_v51  ;;  %vm235_vm4 = vweird.f32 %v667_v51  ;;  %389 = vmatpush.msrb.mxu1 %v296_v46  ;;  %351 = vmatpush.msra.mxu3 %v288_v56  ;;  %v457_v56 = vld [vmem:[#allocation2 + $0x180] sm:$0xff] }
  0xc7   :  { %v672_v8 = vmax.f32 %v126_v60, %v128_v1  ;;  %279 = vmatpush.msra.mxu2 %v251_v47  ;;  %370 = vmatpush.msrb.mxu0 %v292_v52  ;;  %v460_v47 = vld [vmem:[#allocation2 + $0x228] sm:$0xff] }
  0xc8   :  { %390 = vmatpush.msrb.mxu1 %v293_v53 }
  0xc9   :  { %v130_v15 = vsel %vm50_vm0, %v672_v8, 0.0  ;;  %v138_v16 = vmul.f32 %v672_v8, %v672_v8  ;;  %280 = vmatpush.msra.mxu2 %v250_v54  ;;  %371 = vmatpush.msrb.mxu0 %v289_v57  ;;  %v458_v54 = vld [vmem:[#allocation2 + $0x1b8] sm:$0xff] }
  0xca   :  { %v131_v19 = vrot.slane %v130_v15, 4  ;;  %391 = vmatpush.msrb.mxu1 %v290_v61 }
  0xcb   :  { %v139_v23 = vsel %vm50_vm0, %v138_v16, 0.0  ;;  %281 = vmatpush.msra.mxu2 %v249_v13 }
  0xcc   :  { %v670_v7 = vpop.eup %517  ;;  %v132_v26 = vadd.f32 %v131_v19, %v130_v15  ;;  %v140_v27 = vrot.slane %v139_v23, 4 }
  0xcd   :  { %v230_v14 = vmul.f32 %v670_v7, %v667_v51  ;;  %vm236_vm5 = vweird.f32 %v670_v7  ;;  %468 = vmatpush.msrb.mxu2 %v466_v31 }
  0xce   :  { %v133_v34 = vrot.slane %v132_v26, 2  ;;  %v141_v35 = vadd.f32 %v140_v27, %v139_v23  ;;  %vm237_vm6 = vmor %vm235_vm4, %vm236_vm5 }
  0xcf   :  { %v231_v22 = vmul.f32 %v670_v7, %v230_v14 }
  0xd0   :  { %v134_v41 = vadd.f32 %v133_v34, %v132_v26  ;;  %v142_v42 = vrot.slane %v141_v35, 2  ;;  %v465_v34 = vld [vmem:[#allocation2 + $0x340] sm:$0xff] }
  0xd1   :  { %v232_v30 = vmul.f32 0.5, %v231_v22  ;;  %469 = vmatpush.msrb.mxu2 %v465_v34 }
  0xd2   :  { %v135_v48 = vrot.slane %v134_v41, 1  ;;  %v143_v49 = vadd.f32 %v142_v42, %v141_v35 }
  0xd3   :  { %v233_v38 = vsub.f32 1.5, %v232_v30  ;;  %470 = vmatpush.msrb.mxu2 %v464_v36 }
  0xd4   :  { %v144_v51 = vrot.slane %v143_v49, 1  ;;  %v136_v59 = vadd.f32 %v135_v48, %v134_v41  ;;  %v462_v41 = vld [vmem:[#allocation2 + $0x298] sm:$0xff] }
  0xd5   :  { %v234_v45 = vmul.f32 %v670_v7, %v233_v38  ;;  %v463_v38 = vld [vmem:[#allocation2 + $0x2d0] sm:$0xff] }
  0xd6   :  { %v145_v62 = vadd.f32 %v144_v51, %v143_v49  ;;  %v137_v63 = vmul.f32 0.5, %v136_v59  ;;  %471 = vmatpush.msrb.mxu2 %v463_v38 }
  0xd7   :  { %v238_v55 = vsel %vm237_vm6, %v670_v7, %v234_v45 }
  0xd8   :  { %v239_v60 = vmul.f32 %v238_v55, %v647_v58  ;;  %v146_v1 = vmul.f32 0.5, %v145_v62  ;;  %v147_v2 = vmul.f32 %v137_v63, %v137_v63  ;;  %472 = vmatpush.msrb.mxu2 %v462_v41  ;;  %v467_v41 = vperm.slane %v652_v5, 6 }
  0xda   :  { %v242_v0 = vmul.f32 %v239_v60, %v662_v32  ;;  %v240_v4 = vperm.slane %v239_v60, 6  ;;  %v148_v6 = vsub.f32 %v146_v1, %v147_v2  ;;  %473 = vmatpush.msrb.mxu2 %v461_v44  ;;  %v456_v60 = vld [vmem:[#allocation2 + $0x148] sm:$0xff]  ;;  %v454_v1 = vld [vmem:[#allocation2 + $0xd8] sm:$0xff] }
  0xdc   :  { %v244_v3 = vrot.slane %v242_v0, 7  ;;  %v241_v9 = vmul.f32 %v240_v4, %v655_v10  ;;  %v149_v11 = vadd.f32 1e-05, %v148_v6  ;;  %474 = vmatpush.msrb.mxu2 %v460_v47  ;;  %v452_v4 = vld [vmem:[#allocation2 + $0x68] sm:$0xff]  ;;  %v451_v6 = vld [vmem:[#allocation2 + $0x30] sm:$0xff] }
  0xde   :  { %v246_v7 = vsub.f32 %v647_v58, %v244_v3  ;;  %519 = vrsqrt.f32 %v149_v11  ;;  %vm156_vm8 = vweird.f32 %v149_v11  ;;  %475 = vmatpush.msrb.mxu2 %v459_v50  ;;  %v453_v3 = vld [vmem:[#allocation2 + $0xa0] sm:$0xff] }
  0xe0   :  { %v247_v12 = vperm.slane %v246_v7, 7  ;;  %476 = vmatpush.msrb.mxu2 %v458_v54 }
  0xe2   :  { %v248_v14 = vadd.f32 %v247_v12, %v241_v9  ;;  %477 = vmatpush.msrb.mxu2 %v457_v56 }
  0xe4   :  { %282 = vmatmul.f32.vlgmr.msra.gmra.mxu2 %v248_v14  ;;  %v520_v32 = vpop.eup %519 }
  0xe5   :  { %v151_v15 = vmul.f32 %v520_v32, %v149_v11  ;;  %vm157_vm7 = vweird.f32 %v520_v32  ;;  %478 = vmatpush.msrb.mxu2 %v456_v60 }
  0xe6   :  { %vm158_vm9 = vmor %vm156_vm8, %vm157_vm7 }
  0xe7   :  { %v152_v16 = vmul.f32 %v520_v32, %v151_v15 }
  0xe9   :  { %v153_v17 = vmul.f32 0.5, %v152_v16 }
  0xeb   :  { %v154_v18 = vsub.f32 1.5, %v153_v17 }
  0xed   :  { %v155_v19 = vmul.f32 %v520_v32, %v154_v18  ;;  %v265_v18 = vperm.slane %v652_v5, 5 }
  0xef   :  { %v159_v20 = vsel %vm158_vm9, %v520_v32, %v155_v19  ;;  %v440_v32 = vperm.slane %v652_v5, 3 }
  0xf0   :  { %v160_v21 = vmul.f32 %v159_v20, %v647_v58 }
  0xf2   :  { %v163_v10 = vmul.f32 %v160_v21, %v137_v63  ;;  %v161_v22 = vperm.slane %v160_v21, 2  ;;  %v455_v63 = vld [vmem:[#allocation2 + $0x110] sm:$0xff]  ;;  %v444_v21 = vperm.slane %v652_v5, 4 }
  0xf3   :  { %479 = vmatpush.msrb.mxu2 %v455_v63 }
  0xf4   :  { %v165_v23 = vrot.slane %v163_v10, 7  ;;  %v162_v25 = vmul.f32 %v161_v22, %v672_v8 }
  0xf5   :  { %480 = vmatpush.msrb.mxu2 %v454_v1 }
  0xf6   :  { %v167_v24 = vsub.f32 %v647_v58, %v165_v23 }
  0xf7   :  { %481 = vmatpush.msrb.mxu2 %v453_v3 }
  0xf8   :  { %v168_v26 = vperm.slane %v167_v24, 3 }
  0xf9   :  { %482 = vmatpush.msrb.mxu2 %v452_v4 }
  0xfa   :  { %v169_v27 = vadd.f32 %v168_v26, %v162_v25 }
  0xfb   :  { %483 = vmatpush.msrb.mxu2 %v451_v6 }
  0xfc   :  { %352 = vmatmul.f32.vlgmr.msra.gmra.mxu3 %v169_v27  ;;  %372 = vmatmul.f32.vlgmr.msrb.gmra.mxu0 %v169_v27 }
  0xfd   :  { %392 = vmatmul.f32.vlgmr.msrb.gmra.mxu1 %v169_v27 }
 0x167   :  { %v283_v19 = vpop.f32.mrf.mxu2 }
 0x168   :  { %v284_v24 = vadd.f32 %v283_v19, %v265_v18 }
 0x179   :  { %v373_v15 = vpop.f32.mrf.mxu0 }
 0x17a   :  { %v441_v20 = vadd.f32 %v440_v32, %v373_v15  ;;  %v393_v22 = vpop.f32.mrf.mxu1 }
 0x17b   :  { %v445_v27 = vadd.f32 %v444_v21, %v393_v22 }
 0x17c   :  { %v442_v26 = vmul.f32 0.2, %v441_v20 }
 0x17d   :  { %v446_v34 = vmul.f32 0.2, %v445_v27 }
 0x17f   :  { %v353_v29 = vpop.f32.mrf.mxu3  ;;  %v447_v38 = vmax.f32 %v445_v27, %v446_v34 }
 0x180   :  { %v397_v30 = vadd.f32 %v396_v28, %v353_v29 }
 0x182   :  { %v398_v33 = vmul.f32 0.2, %v397_v30 }
 0x184   :  { %v694_v35 = vmax.f32 %v397_v30, %v398_v33  ;;  %v286_v30 = vmul.f32 0.2, %v284_v24  ;;  %v443_v33 = vmax.f32 %v441_v20, %v442_v26 }
 0x186   :  { %v400_v8 = vsel %vm50_vm0, %v694_v35, 0.0  ;;  %v408_v37 = vmul.f32 %v694_v35, %v694_v35 }
 0x187   :  { %v401_v39 = vrot.slane %v400_v8, 4 }
 0x188   :  { %v409_v40 = vsel %vm50_vm0, %v408_v37, 0.0 }
 0x189   :  { %v402_v42 = vadd.f32 %v401_v39, %v400_v8  ;;  %v410_v43 = vrot.slane %v409_v40, 4  ;;  %v287_v8 = vmax.f32 %v284_v24, %v286_v30 }
 0x18b   :  { %v403_v45 = vrot.slane %v402_v42, 2  ;;  %v411_v46 = vadd.f32 %v410_v43, %v409_v40 }
 0x18d   :  { %v404_v48 = vadd.f32 %v403_v45, %v402_v42  ;;  %v412_v49 = vrot.slane %v411_v46, 2 }
 0x18f   :  { %v405_v52 = vrot.slane %v404_v48, 1  ;;  %v413_v53 = vadd.f32 %v412_v49, %v411_v46 }
 0x191   :  { %v406_v55 = vadd.f32 %v405_v52, %v404_v48  ;;  %v414_v51 = vrot.slane %v413_v53, 1 }
 0x193   :  { %v407_v57 = vmul.f32 0.5, %v406_v55  ;;  %v415_v59 = vadd.f32 %v414_v51, %v413_v53 }
 0x195   :  { %v416_v61 = vmul.f32 0.5, %v415_v59  ;;  %v417_v62 = vmul.f32 %v407_v57, %v407_v57 }
 0x197   :  { %v418_v0 = vsub.f32 %v416_v61, %v417_v62 }
 0x199   :  { %v419_v2 = vadd.f32 1e-05, %v418_v0 }
 0x19b   :  { %521 = vrsqrt.f32 %v419_v2  ;;  %vm426_vm11 = vweird.f32 %v419_v2 }
 0x1a1   :  { %v522_v7 = vpop.eup %521 }
 0x1a2   :  { %v421_v9 = vmul.f32 %v522_v7, %v419_v2  ;;  %vm427_vm10 = vweird.f32 %v522_v7 }
 0x1a3   :  { %vm428_vm12 = vmor %vm426_vm11, %vm427_vm10 }
 0x1a4   :  { %v422_v11 = vmul.f32 %v522_v7, %v421_v9 }
 0x1a6   :  { %v423_v12 = vmul.f32 0.5, %v422_v11 }
 0x1a8   :  { %v424_v13 = vsub.f32 1.5, %v423_v12 }
 0x1aa   :  { %v425_v14 = vmul.f32 %v522_v7, %v424_v13 }
 0x1ac   :  { %v429_v16 = vsel %vm428_vm12, %v522_v7, %v425_v14 }
 0x1ad   :  { %v430_v17 = vmul.f32 %v429_v16, %v647_v58 }
 0x1af   :  { %v433_v10 = vmul.f32 %v430_v17, %v407_v57  ;;  %v431_v23 = vperm.slane %v430_v17, 4 }
 0x1b1   :  { %v435_v25 = vrot.slane %v433_v10, 7  ;;  %v432_v29 = vmul.f32 %v431_v23, %v694_v35 }
 0x1b3   :  { %v437_v28 = vsub.f32 %v647_v58, %v435_v25 }
 0x1b5   :  { %v438_v31 = vperm.slane %v437_v28, 5 }
 0x1b7   :  { %v439_v36 = vadd.f32 %v438_v31, %v432_v29 }
 0x1b9   :  { %v448_v37 = vadd.f32 %v443_v33, %v439_v36 }
 0x1bb   :  { %v449_v39 = vadd.f32 %v448_v37, %v287_v8 }
 0x1bd   :  { %v450_v40 = vadd.f32 %v449_v39, %v447_v38 }
 0x1bf   :  { %484 = vmatmul.f32.vlgmr.msrb.gmra.mxu2 %v450_v40 }
 0x242   :  { %v485_v42 = vpop.f32.mrf.mxu2 }
 0x243   :  { %v486_v43 = vadd.f32 %v485_v42, %v467_v41 }
 0x245   :  { %523 = vtanh.f32 %v486_v43 }
 0x24b   :  { %v524_v58 = vpop.eup %523 }
 0x24c   :  { %489 = vst [vmem:[#allocation7] sm:$0x3] %v524_v58 }
 0x24d   :  { %500 = dma.vmem_to_hbm [thread:$0]  %s496_s26, 32, %s498_s29, [#allocation4]  }
 0x24e   :  { %601 = dma.done.wait [#allocation4], 32  }
 0x24f   :  { %602 = vsyncadd [#allocation4], 4294967264 }
 0x250   :  { %505 = vsyncpa [#allocation3], 1 }
 0x251   :  { %506 = vsyncpa [#allocation6], 1 }
 0x252   :  { %507 = vsyncpa [#allocation4], 1 }

</bundles_post_ra>
